<compile_context>
chip_gen: v5e
topology: v5e:2x2
jax: 0.10.0
libtpu: 0.0.40
codegen_flags: <defaults>
</compile_context>

<pallas_src>
import math
import functools

import jax
import jax.numpy as jnp
from jax import lax
from jax.experimental import pallas as pl
from jax.experimental.pallas import tpu as pltpu


# ----------------------------- config -----------------------------
CFG = dict(
    emb_dim=32,
    context_length=8,
    n_heads=4,
    att_drop_rate=0.0,       # dropout == identity
    shortcut_drop_rate=0.0,  # dropout == identity
    qkv_bias=False,
)
GELU_C = math.sqrt(2.0 / math.pi)
NEG_BIG = -1e30


# ----------------------------- kernel -----------------------------
def _transformer_block_kernel(
    x_ref,                      # (BT, E)
    bias_ref,                   # (BT, BT) additive block-diag causal bias (0 / -1e30)
    ln1_s_ref, ln1_b_ref,       # (1, E), (1, E)
    wqkv_ref,                   # (H, E, 3*Dh) fused per-head QKV weight
    wo_ref, bo_ref,             # (E, E), (1, E)
    ln2_s_ref, ln2_b_ref,       # (1, E), (1, E)
    w1_ref, b1_ref,             # (E, 4E), (1, 4E)
    w2_ref, b2_ref,             # (4E, E), (1, E)
    o_ref,                      # (BT, E)
    *, num_heads, head_dim,
):
    x = x_ref[...]                                   # (BT, E)
    BT, E = x.shape
    H, Dh = num_heads, head_dim

    def layernorm(v, scale, shift):
        mean = jnp.mean(v, axis=-1, keepdims=True)
        var = jnp.mean((v - mean) ** 2, axis=-1, keepdims=True)   # unbiased=False
        return scale * ((v - mean) * lax.rsqrt(var + 1e-5)) + shift

    def gelu(v):
        return 0.5 * v * (1.0 + jnp.tanh(GELU_C * (v + 0.044715 * v * v * v)))

    # ---- norm1 + multi-head causal attention ----
    xn = layernorm(x, ln1_s_ref[...], ln1_b_ref[...])

    # Fused QKV projection as a single head-batched dot_general: output comes out
    # directly in (H, BT, 3*Dh) layout -> no per-head lane slicing, no stacks,
    # no in-kernel transposes.
    xn_h = jnp.broadcast_to(xn[None], (H, BT, E))                     # hoisted once
    qkv_h = jnp.einsum("hte,hef->htf", xn_h, wqkv_ref[...],
                       preferred_element_type=jnp.float32)            # (H, BT, 3*Dh)
    qh = qkv_h[:, :, 0 * Dh:1 * Dh]
    kh = qkv_h[:, :, 1 * Dh:2 * Dh]
    vh = qkv_h[:, :, 2 * Dh:3 * Dh]

    inv_sqrt_dh = 1.0 / math.sqrt(Dh)
    scores = jnp.einsum("hqd,hkd->hqk", qh, kh,
                        preferred_element_type=jnp.float32) * inv_sqrt_dh
    scores = scores + bias_ref[...][None]             # precomputed additive mask bias
    m = jnp.max(scores, axis=-1, keepdims=True)
    p = jnp.exp(scores - m)
    denom = jnp.sum(p, axis=-1, keepdims=True)
    attn = p / denom                                  # exact; att dropout rate == 0.0
    ctx = jnp.einsum("hqk,hkd->hqd", attn, vh,
                     preferred_element_type=jnp.float32)              # (H, BT, Dh)

    # Merge heads on the lane axis once, then ONE deep (BT,E)@(E,E) output projection.
    ctx_cat = jnp.concatenate([ctx[h] for h in range(H)], axis=-1)    # (BT, E)
    att_out = jnp.dot(ctx_cat, wo_ref[...],
                      preferred_element_type=jnp.float32) + bo_ref[...]
    # shortcut dropout rate == 0.0 -> identity
    x1 = x + att_out

    # ---- norm2 + feed-forward ----
    xn2 = layernorm(x1, ln2_s_ref[...], ln2_b_ref[...])
    h1 = jnp.dot(xn2, w1_ref[...], preferred_element_type=jnp.float32) + b1_ref[...]
    ff = jnp.dot(gelu(h1), w2_ref[...],
                 preferred_element_type=jnp.float32) + b2_ref[...]
    # shortcut dropout rate == 0.0 -> identity
    o_ref[...] = (x1 + ff).astype(o_ref.dtype)


# ----------------------------- wrapper -----------------------------
def transformer_block_pallas(x, params, cfg):
    B, T, E = x.shape
    H = cfg["n_heads"]
    Dh = E // H
    BT = B * T

    # Flatten tokens (wrapper-side, free).
    x2 = x.reshape(BT, E)

    # Fused per-head QKV weight: (H, E, 3*Dh); for head h, columns [q_h | k_h | v_h].
    def per_head_cols(w):                     # (E, E) -> (H, E, Dh)
        return w.reshape(E, H, Dh).transpose(1, 0, 2)

    wqkv_h = jnp.concatenate(
        [per_head_cols(params["wq"]),
         per_head_cols(params["wk"]),
         per_head_cols(params["wv"])], axis=-1).astype(jnp.float32)    # (H, E, 3*Dh)

    # Block-diagonal causal mask over flattened (batch*seq) tokens as an additive bias.
    row = jnp.arange(BT)[:, None]
    col = jnp.arange(BT)[None, :]
    keep = (row >= col) & ((row // T) == (col // T))
    bias = jnp.where(keep, 0.0, NEG_BIG).astype(jnp.float32)           # (BT, BT)

    def r2(v):                                # 1-D params as explicit (1, N) rows
        return v.reshape(1, -1)

    args = [x2, bias,
            r2(params["ln1_s"]), r2(params["ln1_b"]),
            wqkv_h,
            params["wo"], r2(params["bo"]),
            r2(params["ln2_s"]), r2(params["ln2_b"]),
            params["w1"], r2(params["b1"]),
            params["w2"], r2(params["b2"])]

    kernel = functools.partial(_transformer_block_kernel,
                               num_heads=H, head_dim=Dh)

    def full_spec(shape):
        nd = len(shape)
        return pl.BlockSpec(shape, lambda i, _nd=nd: (0,) * _nd)

    out2 = pl.pallas_call(
        kernel,
        out_shape=jax.ShapeDtypeStruct((BT, E), x.dtype),
        grid_spec=pl.GridSpec(
            grid=(1,),                      # single step: whole batch + weights fit VMEM
            in_specs=[full_spec(a.shape) for a in args],
            out_specs=full_spec((BT, E)),
        ),
        compiler_params=pltpu.CompilerParams(dimension_semantics=("arbitrary",)),
    )(*args)
    return out2.reshape(B, T, E)


# ----------------------------- reference (pure JAX) -----------------------------
def transformer_block_ref(x, p, cfg):
    E, H = cfg["emb_dim"], cfg["n_heads"]
    Dh = E // H
    B, T, _ = x.shape

    def ln(v, s, b):
        m = v.mean(-1, keepdims=True)
        var = ((v - m) ** 2).mean(-1, keepdims=True)
        return s * ((v - m) / jnp.sqrt(var + 1e-5)) + b

    xn = ln(x, p["ln1_s"], p["ln1_b"])
    q = (xn @ p["wq"]).reshape(B, T, H, Dh).transpose(0, 2, 1, 3)
    k = (xn @ p["wk"]).reshape(B, T, H, Dh).transpose(0, 2, 1, 3)
    v = (xn @ p["wv"]).reshape(B, T, H, Dh).transpose(0, 2, 1, 3)
    scores = jnp.einsum("bhqd,bhkd->bhqk", q, k) / math.sqrt(Dh)
    mask = jnp.tril(jnp.ones((T, T), bool))
    scores = jnp.where(mask, scores, -jnp.inf)
    attn = jax.nn.softmax(scores, axis=-1)
    ctx = jnp.einsum("bhqk,bhkd->bhqd", attn, v).transpose(0, 2, 1, 3).reshape(B, T, E)
    x1 = x + (ctx @ p["wo"] + p["bo"])
    xn2 = ln(x1, p["ln2_s"], p["ln2_b"])
    h1 = xn2 @ p["w1"] + p["b1"]
    g = 0.5 * h1 * (1.0 + jnp.tanh(GELU_C * (h1 + 0.044715 * h1 ** 3)))
    return x1 + (g @ p["w2"] + p["b2"])


# ----------------------------- param init -----------------------------
def init_params(key, cfg):
    E = cfg["emb_dim"]
    ks = jax.random.split(key, 8)
    s = 0.02
    return {
        "ln1_s": jnp.ones((E,), jnp.float32),
        "ln1_b": jnp.zeros((E,), jnp.float32),
        "wq": s * jax.random.normal(ks[0], (E, E), jnp.float32),
        "wk": s * jax.random.normal(ks[1], (E, E), jnp.float32),
        "wv": s * jax.random.normal(ks[2], (E, E), jnp.float32),
        "wo": s * jax.random.normal(ks[3], (E, E), jnp.float32),
        "bo": 0.01 * jax.random.normal(ks[4], (E,), jnp.float32),
        "ln2_s": jnp.ones((E,), jnp.float32),
        "ln2_b": jnp.zeros((E,), jnp.float32),
        "w1": s * jax.random.normal(ks[5], (E, 4 * E), jnp.float32),
        "b1": 0.01 * jax.random.normal(ks[6], (4 * E,), jnp.float32),
        "w2": s * jax.random.normal(ks[7], (4 * E, E), jnp.float32),
        "b2": jnp.zeros((E,), jnp.float32),
    }


if __name__ == "__main__":
    key = jax.random.PRNGKey(0)
    kx, kp = jax.random.split(key)
    B, T, E = 2, CFG["context_length"], CFG["emb_dim"]
    x = jax.random.normal(kx, (B, T, E), jnp.float32)
    params = init_params(kp, CFG)

    out = jax.block_until_ready(transformer_block_pallas(x, params, CFG))

    ref = transformer_block_ref(x, params, CFG)
    assert out.shape == (B, T, E)
    max_err = float(jnp.max(jnp.abs(out - ref)))
    assert jnp.allclose(out, ref, atol=1e-3, rtol=1e-3), max_err
    print("KERNEL_OK")
</pallas_src>

<mosaic_0001>
module attributes {stable_mosaic.version = 11 : i64} {
  func.func @_transformer_block_kernel(%arg0: i32, %arg1: memref<16x32xf32, #tpu.memory_space<vmem>>, %arg2: memref<16x16xf32, #tpu.memory_space<vmem>>, %arg3: memref<1x32xf32, #tpu.memory_space<vmem>>, %arg4: memref<1x32xf32, #tpu.memory_space<vmem>>, %arg5: memref<4x32x24xf32, #tpu.memory_space<vmem>>, %arg6: memref<32x32xf32, #tpu.memory_space<vmem>>, %arg7: memref<1x32xf32, #tpu.memory_space<vmem>>, %arg8: memref<1x32xf32, #tpu.memory_space<vmem>>, %arg9: memref<1x32xf32, #tpu.memory_space<vmem>>, %arg10: memref<32x128xf32, #tpu.memory_space<vmem>>, %arg11: memref<1x128xf32, #tpu.memory_space<vmem>>, %arg12: memref<128x32xf32, #tpu.memory_space<vmem>>, %arg13: memref<1x32xf32, #tpu.memory_space<vmem>>, %arg14: memref<16x32xf32, #tpu.memory_space<vmem>>) attributes {dimension_semantics = [#tpu.dimension_semantics<arbitrary>], iteration_bounds = array<i64: 1>, scalar_prefetch = 0 : i64, scratch_operands = 0 : i64, tpu.core_type = #tpu.core_type<tc>, window_params = [{pipeline_mode = #tpu.pipeline_mode<synchronous>, transform_indices = @transform_0, window_bounds = array<i64: 16, 32>}, {pipeline_mode = #tpu.pipeline_mode<synchronous>, transform_indices = @transform_1, window_bounds = array<i64: 16, 16>}, {pipeline_mode = #tpu.pipeline_mode<synchronous>, transform_indices = @transform_2, window_bounds = array<i64: 1, 32>}, {pipeline_mode = #tpu.pipeline_mode<synchronous>, transform_indices = @transform_3, window_bounds = array<i64: 1, 32>}, {pipeline_mode = #tpu.pipeline_mode<synchronous>, transform_indices = @transform_4, window_bounds = array<i64: 4, 32, 24>}, {pipeline_mode = #tpu.pipeline_mode<synchronous>, transform_indices = @transform_5, window_bounds = array<i64: 32, 32>}, {pipeline_mode = #tpu.pipeline_mode<synchronous>, transform_indices = @transform_6, window_bounds = array<i64: 1, 32>}, {pipeline_mode = #tpu.pipeline_mode<synchronous>, transform_indices = @transform_7, window_bounds = array<i64: 1, 32>}, {pipeline_mode = #tpu.pipeline_mode<synchronous>, transform_indices = @transform_8, window_bounds = array<i64: 1, 32>}, {pipeline_mode = #tpu.pipeline_mode<synchronous>, transform_indices = @transform_9, window_bounds = array<i64: 32, 128>}, {pipeline_mode = #tpu.pipeline_mode<synchronous>, transform_indices = @transform_10, window_bounds = array<i64: 1, 128>}, {pipeline_mode = #tpu.pipeline_mode<synchronous>, transform_indices = @transform_11, window_bounds = array<i64: 128, 32>}, {pipeline_mode = #tpu.pipeline_mode<synchronous>, transform_indices = @transform_12, window_bounds = array<i64: 1, 32>}, {pipeline_mode = #tpu.pipeline_mode<synchronous>, transform_indices = @transform_13, window_bounds = array<i64: 16, 32>}]} {
    %c0 = arith.constant 0 : index
    %c0_0 = arith.constant 0 : index
    %0 = vector.load %arg1[%c0, %c0_0] : memref<16x32xf32, #tpu.memory_space<vmem>>, vector<16x32xf32>
    %c0_1 = arith.constant 0 : index
    %c0_2 = arith.constant 0 : index
    %1 = vector.load %arg3[%c0_1, %c0_2] : memref<1x32xf32, #tpu.memory_space<vmem>>, vector<1x32xf32>
    %c0_3 = arith.constant 0 : index
    %c0_4 = arith.constant 0 : index
    %2 = vector.load %arg4[%c0_3, %c0_4] : memref<1x32xf32, #tpu.memory_space<vmem>>, vector<1x32xf32>
    %cst = arith.constant dense<0.000000e+00> : vector<16xf32>
    %3 = vector.multi_reduction <add>, %0, %cst [1] : vector<16x32xf32> to vector<16xf32>
    %4 = vector.shape_cast %3 : vector<16xf32> to vector<16x1xf32>
    %cst_5 = arith.constant 3.200000e+01 : f32
    %5 = vector.broadcast %cst_5 : f32 to vector<16x1xf32>
    %6 = arith.divf %4, %5 : vector<16x1xf32>
    %7 = vector.broadcast %6 : vector<16x1xf32> to vector<16x32xf32>
    %8 = arith.subf %0, %7 : vector<16x32xf32>
    %9 = arith.mulf %8, %8 : vector<16x32xf32>
    %cst_6 = arith.constant dense<0.000000e+00> : vector<16xf32>
    %10 = vector.multi_reduction <add>, %9, %cst_6 [1] : vector<16x32xf32> to vector<16xf32>
    %11 = vector.shape_cast %10 : vector<16xf32> to vector<16x1xf32>
    %cst_7 = arith.constant 3.200000e+01 : f32
    %12 = vector.broadcast %cst_7 : f32 to vector<16x1xf32>
    %13 = arith.divf %11, %12 : vector<16x1xf32>
    %14 = vector.broadcast %6 : vector<16x1xf32> to vector<16x32xf32>
    %15 = arith.subf %0, %14 : vector<16x32xf32>
    %cst_8 = arith.constant 9.99999974E-6 : f32
    %16 = vector.broadcast %cst_8 : f32 to vector<16x1xf32>
    %17 = arith.addf %13, %16 : vector<16x1xf32>
    %18 = math.rsqrt %17 : vector<16x1xf32>
    %19 = vector.broadcast %18 : vector<16x1xf32> to vector<16x32xf32>
    %20 = arith.mulf %15, %19 : vector<16x32xf32>
    %21 = vector.broadcast %1 : vector<1x32xf32> to vector<16x32xf32>
    %22 = arith.mulf %21, %20 : vector<16x32xf32>
    %23 = vector.broadcast %2 : vector<1x32xf32> to vector<16x32xf32>
    %24 = arith.addf %22, %23 : vector<16x32xf32>
    %25 = vector.shape_cast %24 : vector<16x32xf32> to vector<1x16x32xf32>
    %26 = vector.shape_cast %25 : vector<1x16x32xf32> to vector<1x16x32xf32>
    %27 = vector.broadcast %26 : vector<1x16x32xf32> to vector<4x16x32xf32>
    %c0_9 = arith.constant 0 : index
    %c0_10 = arith.constant 0 : index
    %c0_11 = arith.constant 0 : index
    %28 = vector.load %arg5[%c0_9, %c0_10, %c0_11] : memref<4x32x24xf32, #tpu.memory_space<vmem>>, vector<4x32x24xf32>
    "tpu.trace_start"() <{level = 10 : i32, message = "hte,hef->htf"}> : () -> ()
    %cst_12 = arith.constant dense<0.000000e+00> : vector<4x16x24xf32>
    %29 = tpu.matmul %27, %28, %cst_12 {dimension_numbers = #tpu.dot_dimension_numbers<[2], [1], [1], [2], [0, 0, 0, 1, 1, 2], [0], [0]>} : vector<4x16x32xf32>, vector<4x32x24xf32>, vector<4x16x24xf32> -> vector<4x16x24xf32>
    "tpu.trace_stop"() : () -> ()
    %30 = vector.extract_strided_slice %29 {offsets = [0, 0, 0], sizes = [4, 16, 8], strides = [1, 1, 1]} : vector<4x16x24xf32> to vector<4x16x8xf32>
    %31 = vector.extract_strided_slice %29 {offsets = [0, 0, 8], sizes = [4, 16, 8], strides = [1, 1, 1]} : vector<4x16x24xf32> to vector<4x16x8xf32>
    %32 = vector.extract_strided_slice %29 {offsets = [0, 0, 16], sizes = [4, 16, 8], strides = [1, 1, 1]} : vector<4x16x24xf32> to vector<4x16x8xf32>
    "tpu.trace_start"() <{level = 10 : i32, message = "hqd,hkd->hqk"}> : () -> ()
    %cst_13 = arith.constant dense<0.000000e+00> : vector<4x16x16xf32>
    %33 = tpu.matmul %30, %31, %cst_13 {dimension_numbers = #tpu.dot_dimension_numbers<[2], [2], [1], [1], [0, 0, 0, 1, 1, 1], [0], [0]>} : vector<4x16x8xf32>, vector<4x16x8xf32>, vector<4x16x16xf32> -> vector<4x16x16xf32>
    "tpu.trace_stop"() : () -> ()
    %cst_14 = arith.constant 0.353553385 : f32
    %34 = vector.broadcast %cst_14 : f32 to vector<4x16x16xf32>
    %35 = arith.mulf %33, %34 : vector<4x16x16xf32>
    %c0_15 = arith.constant 0 : index
    %c0_16 = arith.constant 0 : index
    %36 = vector.load %arg2[%c0_15, %c0_16] : memref<16x16xf32, #tpu.memory_space<vmem>>, vector<16x16xf32>
    %37 = vector.shape_cast %36 : vector<16x16xf32> to vector<1x16x16xf32>
    %38 = vector.broadcast %37 : vector<1x16x16xf32> to vector<4x16x16xf32>
    %39 = arith.addf %35, %38 : vector<4x16x16xf32>
    %cst_17 = arith.constant dense<0xFF800000> : vector<4x16xf32>
    %40 = vector.multi_reduction <maximumf>, %39, %cst_17 [2] : vector<4x16x16xf32> to vector<4x16xf32>
    %41 = vector.shape_cast %40 : vector<4x16xf32> to vector<4x16x1xf32>
    %42 = vector.broadcast %41 : vector<4x16x1xf32> to vector<4x16x16xf32>
    %43 = arith.subf %39, %42 : vector<4x16x16xf32>
    %44 = math.exp %43 : vector<4x16x16xf32>
    %cst_18 = arith.constant dense<0.000000e+00> : vector<4x16xf32>
    %45 = vector.multi_reduction <add>, %44, %cst_18 [2] : vector<4x16x16xf32> to vector<4x16xf32>
    %46 = vector.shape_cast %45 : vector<4x16xf32> to vector<4x16x1xf32>
    %47 = vector.broadcast %46 : vector<4x16x1xf32> to vector<4x16x16xf32>
    %48 = arith.divf %44, %47 : vector<4x16x16xf32>
    "tpu.trace_start"() <{level = 10 : i32, message = "hqk,hkd->hqd"}> : () -> ()
    %cst_19 = arith.constant dense<0.000000e+00> : vector<4x16x8xf32>
    %49 = tpu.matmul %48, %32, %cst_19 {dimension_numbers = #tpu.dot_dimension_numbers<[2], [1], [1], [2], [0, 0, 0, 1, 1, 2], [0], [0]>} : vector<4x16x16xf32>, vector<4x16x8xf32>, vector<4x16x8xf32> -> vector<4x16x8xf32>
    "tpu.trace_stop"() : () -> ()
    %50 = vector.extract_strided_slice %49 {offsets = [0, 0, 0], sizes = [1, 16, 8], strides = [1, 1, 1]} : vector<4x16x8xf32> to vector<1x16x8xf32>
    %51 = vector.shape_cast %50 : vector<1x16x8xf32> to vector<16x8xf32>
    %52 = vector.extract_strided_slice %49 {offsets = [1, 0, 0], sizes = [1, 16, 8], strides = [1, 1, 1]} : vector<4x16x8xf32> to vector<1x16x8xf32>
    %53 = vector.shape_cast %52 : vector<1x16x8xf32> to vector<16x8xf32>
    %54 = vector.extract_strided_slice %49 {offsets = [2, 0, 0], sizes = [1, 16, 8], strides = [1, 1, 1]} : vector<4x16x8xf32> to vector<1x16x8xf32>
    %55 = vector.shape_cast %54 : vector<1x16x8xf32> to vector<16x8xf32>
    %56 = vector.extract_strided_slice %49 {offsets = [3, 0, 0], sizes = [1, 16, 8], strides = [1, 1, 1]} : vector<4x16x8xf32> to vector<1x16x8xf32>
    %57 = vector.shape_cast %56 : vector<1x16x8xf32> to vector<16x8xf32>
    %58 = tpu.concatenate %51, %53, %55, %57 in 1 : vector<16x8xf32>, vector<16x8xf32>, vector<16x8xf32>, vector<16x8xf32> -> vector<16x32xf32>
    %c0_20 = arith.constant 0 : index
    %c0_21 = arith.constant 0 : index
    %59 = vector.load %arg6[%c0_20, %c0_21] : memref<32x32xf32, #tpu.memory_space<vmem>>, vector<32x32xf32>
    %cst_22 = arith.constant dense<0.000000e+00> : vector<16x32xf32>
    %60 = tpu.matmul %58, %59, %cst_22 {dimension_numbers = #tpu.dot_dimension_numbers<[1], [0], [0], [1], [0, 0, 1, 1], [], []>} : vector<16x32xf32>, vector<32x32xf32>, vector<16x32xf32> -> vector<16x32xf32>
    %c0_23 = arith.constant 0 : index
    %c0_24 = arith.constant 0 : index
    %61 = vector.load %arg7[%c0_23, %c0_24] : memref<1x32xf32, #tpu.memory_space<vmem>>, vector<1x32xf32>
    %62 = vector.broadcast %61 : vector<1x32xf32> to vector<16x32xf32>
    %63 = arith.addf %60, %62 : vector<16x32xf32>
    %64 = arith.addf %0, %63 : vector<16x32xf32>
    %c0_25 = arith.constant 0 : index
    %c0_26 = arith.constant 0 : index
    %65 = vector.load %arg8[%c0_25, %c0_26] : memref<1x32xf32, #tpu.memory_space<vmem>>, vector<1x32xf32>
    %c0_27 = arith.constant 0 : index
    %c0_28 = arith.constant 0 : index
    %66 = vector.load %arg9[%c0_27, %c0_28] : memref<1x32xf32, #tpu.memory_space<vmem>>, vector<1x32xf32>
    %cst_29 = arith.constant dense<0.000000e+00> : vector<16xf32>
    %67 = vector.multi_reduction <add>, %64, %cst_29 [1] : vector<16x32xf32> to vector<16xf32>
    %68 = vector.shape_cast %67 : vector<16xf32> to vector<16x1xf32>
    %cst_30 = arith.constant 3.200000e+01 : f32
    %69 = vector.broadcast %cst_30 : f32 to vector<16x1xf32>
    %70 = arith.divf %68, %69 : vector<16x1xf32>
    %71 = vector.broadcast %70 : vector<16x1xf32> to vector<16x32xf32>
    %72 = arith.subf %64, %71 : vector<16x32xf32>
    %73 = arith.mulf %72, %72 : vector<16x32xf32>
    %cst_31 = arith.constant dense<0.000000e+00> : vector<16xf32>
    %74 = vector.multi_reduction <add>, %73, %cst_31 [1] : vector<16x32xf32> to vector<16xf32>
    %75 = vector.shape_cast %74 : vector<16xf32> to vector<16x1xf32>
    %cst_32 = arith.constant 3.200000e+01 : f32
    %76 = vector.broadcast %cst_32 : f32 to vector<16x1xf32>
    %77 = arith.divf %75, %76 : vector<16x1xf32>
    %78 = vector.broadcast %70 : vector<16x1xf32> to vector<16x32xf32>
    %79 = arith.subf %64, %78 : vector<16x32xf32>
    %cst_33 = arith.constant 9.99999974E-6 : f32
    %80 = vector.broadcast %cst_33 : f32 to vector<16x1xf32>
    %81 = arith.addf %77, %80 : vector<16x1xf32>
    %82 = math.rsqrt %81 : vector<16x1xf32>
    %83 = vector.broadcast %82 : vector<16x1xf32> to vector<16x32xf32>
    %84 = arith.mulf %79, %83 : vector<16x32xf32>
    %85 = vector.broadcast %65 : vector<1x32xf32> to vector<16x32xf32>
    %86 = arith.mulf %85, %84 : vector<16x32xf32>
    %87 = vector.broadcast %66 : vector<1x32xf32> to vector<16x32xf32>
    %88 = arith.addf %86, %87 : vector<16x32xf32>
    %c0_34 = arith.constant 0 : index
    %c0_35 = arith.constant 0 : index
    %89 = vector.load %arg10[%c0_34, %c0_35] : memref<32x128xf32, #tpu.memory_space<vmem>>, vector<32x128xf32>
    %cst_36 = arith.constant dense<0.000000e+00> : vector<16x128xf32>
    %90 = tpu.matmul %88, %89, %cst_36 {dimension_numbers = #tpu.dot_dimension_numbers<[1], [0], [0], [1], [0, 0, 1, 1], [], []>} : vector<16x32xf32>, vector<32x128xf32>, vector<16x128xf32> -> vector<16x128xf32>
    %c0_37 = arith.constant 0 : index
    %c0_38 = arith.constant 0 : index
    %91 = vector.load %arg11[%c0_37, %c0_38] : memref<1x128xf32, #tpu.memory_space<vmem>>, vector<1x128xf32>
    %92 = vector.broadcast %91 : vector<1x128xf32> to vector<16x128xf32>
    %93 = arith.addf %90, %92 : vector<16x128xf32>
    %cst_39 = arith.constant 5.000000e-01 : f32
    %94 = vector.broadcast %cst_39 : f32 to vector<16x128xf32>
    %95 = arith.mulf %94, %93 : vector<16x128xf32>
    %cst_40 = arith.constant 4.471500e-02 : f32
    %96 = vector.broadcast %cst_40 : f32 to vector<16x128xf32>
    %97 = arith.mulf %96, %93 : vector<16x128xf32>
    %98 = arith.mulf %97, %93 : vector<16x128xf32>
    %99 = arith.mulf %98, %93 : vector<16x128xf32>
    %100 = arith.addf %93, %99 : vector<16x128xf32>
    %cst_41 = arith.constant 0.797884583 : f32
    %101 = vector.broadcast %cst_41 : f32 to vector<16x128xf32>
    %102 = arith.mulf %101, %100 : vector<16x128xf32>
    %103 = math.tanh %102 : vector<16x128xf32>
    %cst_42 = arith.constant 1.000000e+00 : f32
    %104 = vector.broadcast %cst_42 : f32 to vector<16x128xf32>
    %105 = arith.addf %104, %103 : vector<16x128xf32>
    %106 = arith.mulf %95, %105 : vector<16x128xf32>
    %c0_43 = arith.constant 0 : index
    %c0_44 = arith.constant 0 : index
    %107 = vector.load %arg12[%c0_43, %c0_44] : memref<128x32xf32, #tpu.memory_space<vmem>>, vector<128x32xf32>
    %cst_45 = arith.constant dense<0.000000e+00> : vector<16x32xf32>
    %108 = tpu.matmul %106, %107, %cst_45 {dimension_numbers = #tpu.dot_dimension_numbers<[1], [0], [0], [1], [0, 0, 1, 1], [], []>} : vector<16x128xf32>, vector<128x32xf32>, vector<16x32xf32> -> vector<16x32xf32>
    %c0_46 = arith.constant 0 : index
    %c0_47 = arith.constant 0 : index
    %109 = vector.load %arg13[%c0_46, %c0_47] : memref<1x32xf32, #tpu.memory_space<vmem>>, vector<1x32xf32>
    %110 = vector.broadcast %109 : vector<1x32xf32> to vector<16x32xf32>
    %111 = arith.addf %108, %110 : vector<16x32xf32>
    %112 = arith.addf %64, %111 : vector<16x32xf32>
    %c0_48 = arith.constant 0 : index
    %c0_49 = arith.constant 0 : index
    %113 = vector.load %arg14[%c0_48, %c0_49] : memref<16x32xf32, #tpu.memory_space<vmem>>, vector<16x32xf32>
    tpu.vector_store %arg14[%c0_48, %c0_49], %112 {strides = array<i32>} : memref<16x32xf32, #tpu.memory_space<vmem>>, vector<16x32xf32>,
    return
  }
  func.func @transform_0(%arg0: i32) -> (i32, i32) {
    %c0_i32 = arith.constant 0 : i32
    %c0_i32_0 = arith.constant 0 : i32
    %c0_i32_1 = arith.constant 0 : i32
    return %c0_i32, %c0_i32_0 : i32, i32
  }
  func.func @transform_1(%arg0: i32) -> (i32, i32) {
    %c0_i32 = arith.constant 0 : i32
    %c0_i32_0 = arith.constant 0 : i32
    %c0_i32_1 = arith.constant 0 : i32
    return %c0_i32, %c0_i32_0 : i32, i32
  }
  func.func @transform_2(%arg0: i32) -> (i32, i32) {
    %c0_i32 = arith.constant 0 : i32
    %c0_i32_0 = arith.constant 0 : i32
    %c0_i32_1 = arith.constant 0 : i32
    return %c0_i32, %c0_i32_0 : i32, i32
  }
  func.func @transform_3(%arg0: i32) -> (i32, i32) {
    %c0_i32 = arith.constant 0 : i32
    %c0_i32_0 = arith.constant 0 : i32
    %c0_i32_1 = arith.constant 0 : i32
    return %c0_i32, %c0_i32_0 : i32, i32
  }
  func.func @transform_4(%arg0: i32) -> (i32, i32, i32) {
    %c0_i32 = arith.constant 0 : i32
    %c0_i32_0 = arith.constant 0 : i32
    %c0_i32_1 = arith.constant 0 : i32
    %c0_i32_2 = arith.constant 0 : i32
    return %c0_i32, %c0_i32_0, %c0_i32_1 : i32, i32, i32
  }
  func.func @transform_5(%arg0: i32) -> (i32, i32) {
    %c0_i32 = arith.constant 0 : i32
    %c0_i32_0 = arith.constant 0 : i32
    %c0_i32_1 = arith.constant 0 : i32
    return %c0_i32, %c0_i32_0 : i32, i32
  }
  func.func @transform_6(%arg0: i32) -> (i32, i32) {
    %c0_i32 = arith.constant 0 : i32
    %c0_i32_0 = arith.constant 0 : i32
    %c0_i32_1 = arith.constant 0 : i32
    return %c0_i32, %c0_i32_0 : i32, i32
  }
  func.func @transform_7(%arg0: i32) -> (i32, i32) {
    %c0_i32 = arith.constant 0 : i32
    %c0_i32_0 = arith.constant 0 : i32
    %c0_i32_1 = arith.constant 0 : i32
    return %c0_i32, %c0_i32_0 : i32, i32
  }
  func.func @transform_8(%arg0: i32) -> (i32, i32) {
    %c0_i32 = arith.constant 0 : i32
    %c0_i32_0 = arith.constant 0 : i32
    %c0_i32_1 = arith.constant 0 : i32
    return %c0_i32, %c0_i32_0 : i32, i32
  }
  func.func @transform_9(%arg0: i32) -> (i32, i32) {
    %c0_i32 = arith.constant 0 : i32
    %c0_i32_0 = arith.constant 0 : i32
    %c0_i32_1 = arith.constant 0 : i32
    return %c0_i32, %c0_i32_0 : i32, i32
  }
  func.func @transform_10(%arg0: i32) -> (i32, i32) {
    %c0_i32 = arith.constant 0 : i32
    %c0_i32_0 = arith.constant 0 : i32
    %c0_i32_1 = arith.constant 0 : i32
    return %c0_i32, %c0_i32_0 : i32, i32
  }
  func.func @transform_11(%arg0: i32) -> (i32, i32) {
    %c0_i32 = arith.constant 0 : i32
    %c0_i32_0 = arith.constant 0 : i32
    %c0_i32_1 = arith.constant 0 : i32
    return %c0_i32, %c0_i32_0 : i32, i32
  }
  func.func @transform_12(%arg0: i32) -> (i32, i32) {
    %c0_i32 = arith.constant 0 : i32
    %c0_i32_0 = arith.constant 0 : i32
    %c0_i32_1 = arith.constant 0 : i32
    return %c0_i32, %c0_i32_0 : i32, i32
  }
  func.func @transform_13(%arg0: i32) -> (i32, i32) {
    %c0_i32 = arith.constant 0 : i32
    %c0_i32_0 = arith.constant 0 : i32
    %c0_i32_1 = arith.constant 0 : i32
    return %c0_i32, %c0_i32_0 : i32, i32
  }
}

</mosaic_0001>

<bundles_post_ra>
// kernel: tpu_custom_call.1
= control target key start
LH: loop header
LB: loop body
LE: loop exit
PB: predicated region body
PF: predicated region fallthrough
CT: control target
= control target key end

     0   :  { %vm49_vm0 = vcmask 261120   ;;  %s1608_s0 = inlined_call_operand.vmem [shape: f32[16,32], index: 0, kind: input, shape index: {}]   ;;  %s1609_s1 = inlined_call_operand.vmem [shape: f32[16,16], index: 1, kind: input, shape index: {}]   ;;  %s1610_s2 = inlined_call_operand.vmem [shape: f32[1,32], index: 2, kind: input, shape index: {}]   ;;  %s1611_s3 = inlined_call_operand.vmem [shape: f32[1,32], index: 3, kind: input, shape index: {}]   ;;  %s1612_s4 = inlined_call_operand.vmem [shape: f32[4,32,24], index: 4, kind: input, shape index: {}]   ;;  %s1613_s5 = inlined_call_operand.vmem [shape: f32[32,32], index: 5, kind: input, shape index: {}]   ;;  %s1614_s6 = inlined_call_operand.vmem [shape: f32[1,32], index: 6, kind: input, shape index: {}]   ;;  %s1615_s7 = inlined_call_operand.vmem [shape: f32[1,32], index: 7, kind: input, shape index: {}]   ;;  %s1616_s8 = inlined_call_operand.vmem [shape: f32[1,32], index: 8, kind: input, shape index: {}]   ;;  %s1617_s9 = inlined_call_operand.vmem [shape: f32[32,128], index: 9, kind: input, shape index: {}]   ;;  %s1618_s10 = inlined_call_operand.vmem [shape: f32[1,128], index: 10, kind: input, shape index: {}]   ;;  %s1619_s11 = inlined_call_operand.vmem [shape: f32[128,32], index: 11, kind: input, shape index: {}]   ;;  %s1620_s12 = inlined_call_operand.vmem [shape: f32[1,32], index: 12, kind: input, shape index: {}]   ;;  %s1621_s13 = inlined_call_operand.hbm [shape: f32[16,32], index: 13, kind: output, shape index: {}]  }
   0x1   :  { %v1195_v0 = vld [vmem:[%s1608_s0] sm:$0xff] }
   0x2   :  { %v50_v1 = vsel %vm49_vm0, %v1195_v0, 0.0 }
   0x3   :  { %51 = vadd.xlane.f32.xlu0 %v50_v1 }
   0x4   :  { %18 = vsyncpa [#allocation3], 0  ;;  %v1202_v2 = vld [vmem:[%s1608_s0 + $0x8] sm:$0xff]  ;;  %v1114_v4 = vmov 32.0   ;;  %v114_v21 = vld [vmem:[%s1612_s4 + $0x18] sm:$0xff]  ;;  %vm231_vm8 = vcmask 64512  }
   0x5   :  { %v53_v3 = vsel %vm49_vm0, %v1202_v2, 0.0  ;;  %1042 = vrcp.f32 %v1114_v4  ;;  %v118_v22 = vld [vmem:[%s1612_s4 + $0x38] sm:$0xff]  ;;  %145 = vmatpush.msra.mxu0 %v114_v21  ;;  %v113_v24 = vld [vmem:[%s1612_s4 + $0x10] sm:$0xff]  ;;  %v112_v27 = vld [vmem:[%s1612_s4 + $0x8] sm:$0xff]  ;;  %vm392_vm9 = vcmask 130048   ;;  %s1117_s30 = smov 8  }
   0x6   :  { %v122_v23 = vld [vmem:[%s1612_s4 + $0x58] sm:$0xff]  ;;  %168 = vmatpush.msra.mxu1 %v118_v22  ;;  %v117_v25 = vld [vmem:[%s1612_s4 + $0x30] sm:$0xff]  ;;  %v116_v28 = vld [vmem:[%s1612_s4 + $0x28] sm:$0xff]  ;;  %s1118_s14 = smov 24   ;;  %s1119_s15 = smov 16  }
   0x7   :  { %191 = vmatpush.msra.mxu3 %v122_v23  ;;  %v121_v26 = vld [vmem:[%s1612_s4 + $0x50] sm:$0xff]  ;;  %146 = vmatpush.msra.mxu0 %v113_v24  ;;  %v120_v29 = vld [vmem:[%s1612_s4 + $0x48] sm:$0xff]  ;;  %v111_v30 = vld [vmem:[%s1612_s4] sm:$0xff]  ;;  %s1120_s23 = smov [#allocation2]  }
   0x8   :  { %169 = vmatpush.msra.mxu1 %v117_v25  ;;  %v115_v31 = vld [vmem:[%s1612_s4 + $0x20] sm:$0xff]  ;;  %v126_v36 = vld [vmem:[%s1612_s4 + $0x78] sm:$0xff]  ;;  %v125_v37 = vld [vmem:[%s1612_s4 + $0x70] sm:$0xff] }
   0x9   :  { %192 = vmatpush.msra.mxu3 %v121_v26  ;;  %147 = vmatpush.msra.mxu0 %v112_v27  ;;  %v119_v32 = vld [vmem:[%s1612_s4 + $0x40] sm:$0xff]  ;;  %v124_v39 = vld [vmem:[%s1612_s4 + $0x68] sm:$0xff] }
   0xa   :  { %170 = vmatpush.msra.mxu1 %v116_v28  ;;  %v123_v41 = vld [vmem:[%s1612_s4 + $0x60] sm:$0xff]  ;;  %v383_v26 = vld [vmem:[%s1609_s1 + $0x8] sm:$0xff] }
   0xb   :  { %54 = vadd.xlane.f32.xlu0 %v53_v3  ;;  %v1043_v5 = vpop.eup %1042  ;;  %193 = vmatpush.msra.mxu3 %v120_v29  ;;  %v1035_v51 = vld [vmem:[%s1610_s2] ss:$0 sm:$0xff]  ;;  %s1115_s2 = smov 120  }
   0xc   :  { %v57_v6 = vmul.f32 32.0, %v1043_v5  ;;  %vm61_vm1 = vweird.f32 %v1043_v5  ;;  %148 = vmatpush.msra.mxu0 %v111_v30  ;;  %171 = vmatpush.msra.mxu1 %v115_v31  ;;  %v1036_v55 = vld [vmem:[%s1611_s3] ss:$0 sm:$0xff] }
   0xd   :  { %194 = vmatpush.msra.mxu3 %v119_v32  ;;  %v382_v21 = vld [vmem:[%s1609_s1] sm:$0xff]  ;;  %s1116_s1 = smov 112  }
   0xe   :  { %v58_v7 = vsub.f32 1.0, %v57_v6 }
   0xf   :  { %214 = vmatpush.msrb.mxu3 %v126_v36 }
  0x10   :  { %v59_v8 = vmul.f32 %v1043_v5, %v58_v7 }
  0x11   :  { %215 = vmatpush.msrb.mxu3 %v125_v37 }
  0x12   :  { %v60_v9 = vadd.f32 %v1043_v5, %v59_v8 }
  0x13   :  { %216 = vmatpush.msrb.mxu3 %v124_v39 }
  0x14   :  { %v1206_v10 = vsel %vm61_vm1, %v1043_v5, %v60_v9 }
  0x15   :  { %217 = vmatpush.msrb.mxu3 %v123_v41 }
  0x76   :  { %v52_v11 = vpop.xlane.xlu0 %51 }
  0x77   :  { %v63_v12 = vmul.f32 %v1206_v10, %v52_v11 }
  0x79   :  { %v1210_v13 = vsub.f32 %v1195_v0, %v63_v12 }
  0x7b   :  { %v67_v14 = vmul.f32 %v1210_v13, %v1210_v13 }
  0x7d   :  { %v69_v15 = vsel %vm49_vm0, %v67_v14, 0.0 }
  0x7e   :  { %70 = vadd.xlane.f32.xlu1 %v69_v15  ;;  %v55_v16 = vpop.xlane.xlu0 %54 }
  0x7f   :  { %v64_v17 = vmul.f32 %v1206_v10, %v55_v16 }
  0x81   :  { %v1217_v18 = vsub.f32 %v1202_v2, %v64_v17 }
  0x83   :  { %v68_v19 = vmul.f32 %v1217_v18, %v1217_v18 }
  0x85   :  { %v72_v20 = vsel %vm49_vm0, %v68_v19, 0.0 }
  0x86   :  { %73 = vadd.xlane.f32.xlu1 %v72_v20 }
  0xf1   :  { %v71_v33 = vpop.xlane.xlu1 %70 }
  0xf2   :  { %v75_v34 = vmul.f32 %v71_v33, %v1206_v10 }
  0xf4   :  { %v77_v35 = vadd.f32 1e-05, %v75_v34 }
  0xf6   :  { %1044 = vrsqrt.f32 %v77_v35  ;;  %vm85_vm3 = vweird.f32 %v77_v35 }
  0xf9   :  { %v74_v38 = vpop.xlane.xlu1 %73 }
  0xfa   :  { %v76_v40 = vmul.f32 %v74_v38, %v1206_v10 }
  0xfc   :  { %v1045_v42 = vpop.eup %1044  ;;  %v78_v43 = vadd.f32 1e-05, %v76_v40 }
  0xfd   :  { %v80_v44 = vmul.f32 %v1045_v42, %v77_v35  ;;  %vm86_vm2 = vweird.f32 %v1045_v42 }
  0xfe   :  { %1046 = vrsqrt.f32 %v78_v43  ;;  %vm87_vm4 = vmor %vm85_vm3, %vm86_vm2  ;;  %vm95_vm6 = vweird.f32 %v78_v43 }
  0xff   :  { %v81_v45 = vmul.f32 %v1045_v42, %v80_v44 }
 0x101   :  { %v82_v46 = vmul.f32 0.5, %v81_v45 }
 0x103   :  { %v83_v47 = vsub.f32 1.5, %v82_v46 }
 0x104   :  { %v1047_v48 = vpop.eup %1046 }
 0x105   :  { %v84_v49 = vmul.f32 %v1045_v42, %v83_v47  ;;  %v90_v50 = vmul.f32 %v1047_v48, %v78_v43  ;;  %vm96_vm5 = vweird.f32 %v1047_v48 }
 0x106   :  { %vm97_vm7 = vmor %vm95_vm6, %vm96_vm5 }
 0x107   :  { %v88_v52 = vsel %vm87_vm4, %v1045_v42, %v84_v49  ;;  %v91_v53 = vmul.f32 %v1047_v48, %v90_v50 }
 0x108   :  { %v99_v54 = vmul.f32 %v88_v52, %v1210_v13 }
 0x109   :  { %v92_v56 = vmul.f32 0.5, %v91_v53 }
 0x10a   :  { %v104_v57 = vmul.f32 %v1035_v51, %v99_v54 }
 0x10b   :  { %v93_v58 = vsub.f32 1.5, %v92_v56 }
 0x10c   :  { %v109_v59 = vadd.f32 %v1036_v55, %v104_v57 }
 0x10d   :  { %v94_v60 = vmul.f32 %v1047_v48, %v93_v58 }
 0x10e   :  { %971 = vmatmul.msk.f32.vlgmr.msra.gmra.mxu0 %vm49_vm0, %v109_v59  ;;  %973 = vmatmul.msk.f32.vlgmr.msra.gmra.mxu1 %vm49_vm0, %v109_v59 }
 0x10f   :  { %v98_v61 = vsel %vm97_vm7, %v1047_v48, %v94_v60  ;;  %975 = vmatmul.msk.f32.vlgmr.msra.gmra.mxu3 %vm49_vm0, %v109_v59 }
 0x110   :  { %v100_v62 = vmul.f32 %v98_v61, %v1217_v18 }
 0x112   :  { %v105_v63 = vmul.f32 %v1035_v51, %v100_v62 }
 0x114   :  { %v110_v1 = vadd.f32 %v1036_v55, %v105_v63 }
 0x116   :  { %972 = vmatmul.msk.f32.gmra.mxu0 %vm49_vm0, %v110_v1  ;;  %974 = vmatmul.msk.f32.gmra.mxu1 %vm49_vm0, %v110_v1 }
 0x117   :  { %976 = vmatmul.msk.f32.gmra.mxu3 %vm49_vm0, %v110_v1 }
 0x11f   :  { %977 = vmatmul.msk.f32.vlgmr.msrb.gmra.mxu3 %vm49_vm0, %v109_v59 }
 0x127   :  { %978 = vmatmul.msk.f32.gmra.mxu3 %vm49_vm0, %v110_v1 }
 0x18b   :  { %v1291_v4 = vpop.f32.mrf.mxu0  ;;  %v1300_v7 = vpop.f32.mrf.mxu1 }
 0x192   :  { %v1288_v3 = vpop.f32.mrf.mxu3 }
 0x193   :  { %302 = vrot.lane.b32.xlu0 %v1288_v3, %s1115_s2  ;;  %v1305_v9 = vpop.f32.mrf.mxu1  ;;  %v1309_v11 = vpop.f32.mrf.mxu0 }
 0x19a   :  { %v1293_v5 = vpop.f32.mrf.mxu3 }
 0x19b   :  { %227 = vrot.lane.b32.xlu0 %v1291_v4, %s1115_s2  ;;  %304 = vrot.lane.b32.xlu2 %v1293_v5, %s1115_s2 }
 0x1a2   :  { %v1297_v6 = vpop.f32.mrf.mxu3 }
 0x1a3   :  { %339 = vrot.lane.b32.xlu1 %v1297_v6, %s1115_s2 }
 0x1aa   :  { %v1302_v8 = vpop.f32.mrf.mxu3 }
 0x1ab   :  { %341 = vrot.lane.b32.xlu2 %v1302_v8, %s1115_s2 }
 0x1b3   :  { %267 = vrot.lane.b32.xlu2 %v1305_v9, %s1115_s2 }
 0x1bb   :  { %265 = vrot.lane.b32.xlu2 %v1300_v7, %s1115_s2 }
 0x1c3   :  { %229 = vrot.lane.b32.xlu2 %v1309_v11, %s1115_s2 }
 0x1f5   :  { %v305_v12 = vpop.permute.xlu2 %304 }
 0x1f6   :  { %987 = vmatpush.xpose.msk.msra.mxu2 %vm231_vm8, %v305_v12 }
 0x205   :  { %v342_v13 = vpop.permute.xlu2 %341  ;;  %v303_v14 = vpop.permute.xlu0 %302 }
 0x206   :  { %988 = vmatpush.xpose.msk.msra.mxu2 %vm231_vm8, %v303_v14  ;;  %991 = vmatpush.xpose.msk.msra.mxu3 %vm231_vm8, %v342_v13 }
 0x209   :  { %989 = vmatmul.msk.f32.vlgmr.msra.gmra.mxu2 %vm231_vm8, %v1288_v3 }
 0x20d   :  { %v268_v15 = vpop.permute.xlu2 %267  ;;  %v228_v19 = vpop.permute.xlu0 %227 }
 0x20e   :  { %983 = vmatpush.xpose.msk.msrb.mxu1 %vm231_vm8, %v268_v15 }
 0x211   :  { %990 = vmatmul.msk.f32.gmra.mxu2 %vm231_vm8, %v1293_v5 }
 0x215   :  { %v340_v16 = vpop.permute.xlu1 %339  ;;  %v266_v17 = vpop.permute.xlu2 %265 }
 0x216   :  { %984 = vmatpush.xpose.msk.msrb.mxu1 %vm231_vm8, %v266_v17  ;;  %992 = vmatpush.xpose.msk.msra.mxu3 %vm231_vm8, %v340_v16 }
 0x219   :  { %985 = vmatmul.msk.f32.vlgmr.msrb.gmra.mxu1 %vm231_vm8, %v1300_v7  ;;  %993 = vmatmul.msk.f32.vlgmr.msra.gmra.mxu3 %vm231_vm8, %v1297_v6 }
 0x21d   :  { %v230_v18 = vpop.permute.xlu2 %229 }
 0x21e   :  { %979 = vmatpush.xpose.msk.msrb.mxu0 %vm231_vm8, %v230_v18 }
 0x221   :  { %986 = vmatmul.msk.f32.gmra.mxu1 %vm231_vm8, %v1305_v9  ;;  %994 = vmatmul.msk.f32.gmra.mxu3 %vm231_vm8, %v1302_v8 }
 0x222   :  { %980 = vmatpush.xpose.msk.msrb.mxu0 %vm231_vm8, %v228_v19 }
 0x225   :  { %981 = vmatmul.msk.f32.vlgmr.msrb.gmra.mxu0 %vm231_vm8, %v1291_v4 }
 0x22d   :  { %982 = vmatmul.msk.f32.gmra.mxu0 %vm231_vm8, %v1309_v11 }
 0x28c   :  { %v331_v20 = vpop.f32.mrf.mxu2 }
 0x28d   :  { %v378_v22 = vmul.f32 0.35355338, %v331_v20 }
 0x28f   :  { %v388_v23 = vadd.f32 %v382_v21, %v378_v22 }
 0x291   :  { %v405_v24 = vsel %vm392_vm9, %v388_v23, -inf }
 0x292   :  { %406 = vmax.xlane.f32.xlu2 %v405_v24 }
 0x294   :  { %v334_v25 = vpop.f32.mrf.mxu2 }
 0x295   :  { %v379_v27 = vmul.f32 0.35355338, %v334_v25 }
 0x296   :  { %v294_v28 = vpop.f32.mrf.mxu1 }
 0x297   :  { %v376_v29 = vmul.f32 0.35355338, %v294_v28  ;;  %v389_v30 = vadd.f32 %v383_v26, %v379_v27 }
 0x299   :  { %v408_v31 = vsel %vm392_vm9, %v389_v30, -inf  ;;  %v386_v32 = vadd.f32 %v382_v21, %v376_v29 }
 0x29a   :  { %409 = vmax.xlane.f32.xlu2 %v408_v31  ;;  %v1015_v31 = vpack.i.bf16 %v1302_v8, %v1293_v5 }
 0x29b   :  { %v399_v33 = vsel %vm392_vm9, %v386_v32, -inf }
 0x29c   :  { %v368_v34 = vpop.f32.mrf.mxu3  ;;  %400 = vmax.xlane.f32.xlu0 %v399_v33  ;;  %v1020_v33 = vpack.i.bf16 %v1297_v6, %v1288_v3 }
 0x29d   :  { %v380_v35 = vmul.f32 0.35355338, %v368_v34  ;;  %v1030_v34 = vpack.i.bf16 %v1291_v4, %v1309_v11 }
 0x29e   :  { %v297_v36 = vpop.f32.mrf.mxu1 }
 0x29f   :  { %v377_v37 = vmul.f32 0.35355338, %v297_v36  ;;  %v390_v38 = vadd.f32 %v382_v21, %v380_v35 }
 0x2a1   :  { %v411_v39 = vsel %vm392_vm9, %v390_v38, -inf  ;;  %v387_v40 = vadd.f32 %v383_v26, %v377_v37 }
 0x2a2   :  { %412 = vmax.xlane.f32.xlu1 %v411_v39  ;;  %v257_v41 = vpop.f32.mrf.mxu0 }
 0x2a3   :  { %v374_v42 = vmul.f32 0.35355338, %v257_v41  ;;  %v402_v43 = vsel %vm392_vm9, %v387_v40, -inf }
 0x2a4   :  { %v371_v44 = vpop.f32.mrf.mxu3  ;;  %403 = vmax.xlane.f32.xlu0 %v402_v43 }
 0x2a5   :  { %v381_v45 = vmul.f32 0.35355338, %v371_v44  ;;  %v1347_v46 = vadd.f32 %v382_v21, %v374_v42 }
 0x2a7   :  { %v393_v47 = vsel %vm392_vm9, %v1347_v46, -inf  ;;  %v391_v48 = vadd.f32 %v383_v26, %v381_v45 }
 0x2a8   :  { %394 = vmax.xlane.f32.xlu2 %v393_v47 }
 0x2a9   :  { %v414_v49 = vsel %vm392_vm9, %v391_v48, -inf }
 0x2aa   :  { %415 = vmax.xlane.f32.xlu1 %v414_v49  ;;  %v260_v50 = vpop.f32.mrf.mxu0 }
 0x2ab   :  { %v375_v51 = vmul.f32 0.35355338, %v260_v50 }
 0x2ad   :  { %v1352_v52 = vadd.f32 %v383_v26, %v375_v51 }
 0x2af   :  { %v396_v53 = vsel %vm392_vm9, %v1352_v52, -inf }
 0x2b2   :  { %397 = vmax.xlane.f32.xlu1 %v396_v53 }
 0x305   :  { %v407_v54 = vpop.xlane.xlu2 %406 }
 0x306   :  { %v421_v55 = vsub.f32 %v388_v23, %v407_v54 }
 0x308   :  { %v433_v56 = vmul.f32 1.442695, %v421_v55 }
 0x30a   :  { %1048 = vpow2.f32 %v433_v56 }
 0x30d   :  { %v410_v57 = vpop.xlane.xlu2 %409 }
 0x30e   :  { %v422_v58 = vsub.f32 %v389_v30, %v410_v57 }
 0x30f   :  { %v401_v59 = vpop.xlane.xlu0 %400 }
 0x310   :  { %v1356_v60 = vpop.eup %1048  ;;  %v435_v61 = vmul.f32 1.442695, %v422_v58  ;;  %v419_v62 = vsub.f32 %v386_v32, %v401_v59  ;;  %v1025_v32 = vpack.i.bf16 %v1300_v7, %v1305_v9 }
 0x311   :  { %v453_v63 = vsel %vm392_vm9, %v1356_v60, 0.0 }
 0x312   :  { %1050 = vpow2.f32 %v435_v61  ;;  %v429_v1 = vmul.f32 1.442695, %v419_v62  ;;  %454 = vadd.xlane.f32.xlu0 %v453_v63 }
 0x314   :  { %1052 = vpow2.f32 %v429_v1 }
 0x315   :  { %v413_v12 = vpop.xlane.xlu1 %412 }
 0x316   :  { %v423_v13 = vsub.f32 %v390_v38, %v413_v12 }
 0x317   :  { %v404_v14 = vpop.xlane.xlu0 %403 }
 0x318   :  { %v1360_v15 = vpop.eup %1050  ;;  %v437_v16 = vmul.f32 1.442695, %v423_v13  ;;  %v420_v17 = vsub.f32 %v387_v40, %v404_v14 }
 0x319   :  { %v456_v18 = vsel %vm392_vm9, %v1360_v15, 0.0 }
 0x31a   :  { %v1364_v19 = vpop.eup %1052  ;;  %1054 = vpow2.f32 %v437_v16  ;;  %v431_v20 = vmul.f32 1.442695, %v420_v17  ;;  %457 = vadd.xlane.f32.xlu0 %v456_v18 }
 0x31b   :  { %v447_v21 = vsel %vm392_vm9, %v1364_v19, 0.0  ;;  %v395_v35 = vpop.xlane.xlu2 %394 }
 0x31c   :  { %1056 = vpow2.f32 %v431_v20  ;;  %448 = vadd.xlane.f32.xlu1 %v447_v21  ;;  %v417_v36 = vsub.f32 %v1347_v46, %v395_v35 }
 0x31d   :  { %v416_v22 = vpop.xlane.xlu1 %415 }
 0x31e   :  { %v424_v23 = vsub.f32 %v391_v48, %v416_v22  ;;  %v425_v37 = vmul.f32 1.442695, %v417_v36 }
 0x320   :  { %v1368_v24 = vpop.eup %1054  ;;  %v439_v25 = vmul.f32 1.442695, %v424_v23 }
 0x321   :  { %v459_v26 = vsel %vm392_vm9, %v1368_v24, 0.0 }
 0x322   :  { %v1372_v27 = vpop.eup %1056  ;;  %1058 = vpow2.f32 %v439_v25  ;;  %460 = vadd.xlane.f32.xlu2 %v459_v26 }
 0x323   :  { %v450_v28 = vsel %vm392_vm9, %v1372_v27, 0.0  ;;  %1060 = vpow2.f32 %v425_v37 }
 0x324   :  { %451 = vadd.xlane.f32.xlu1 %v450_v28 }
 0x325   :  { %v398_v8 = vpop.xlane.xlu1 %397 }
 0x326   :  { %v418_v9 = vsub.f32 %v1352_v52, %v398_v8 }
 0x328   :  { %v1376_v29 = vpop.eup %1058  ;;  %v427_v3 = vmul.f32 1.442695, %v418_v9 }
 0x329   :  { %v462_v30 = vsel %vm392_vm9, %v1376_v29, 0.0  ;;  %v1389_v5 = vpop.eup %1060 }
 0x32a   :  { %463 = vadd.xlane.f32.xlu2 %v462_v30  ;;  %v441_v7 = vsel %vm392_vm9, %v1389_v5, 0.0  ;;  %1062 = vpow2.f32 %v427_v3 }
 0x32e   :  { %1016 = vrot.lane.b32.xlu0 %v1015_v31, %s1116_s1 }
 0x330   :  { %v1394_v6 = vpop.eup %1062 }
 0x331   :  { %v444_v4 = vsel %vm392_vm9, %v1394_v6, 0.0 }
 0x33d   :  { %1026 = vrot.lane.b32.xlu1 %v1025_v32, %s1116_s1 }
 0x342   :  { %1021 = vrot.lane.b32.xlu2 %v1020_v33, %s1116_s1 }
 0x345   :  { %1031 = vrot.lane.b32.xlu1 %v1030_v34, %s1116_s1 }
 0x358   :  { %442 = vadd.xlane.f32.xlu0 %v441_v7 }
 0x36b   :  { %445 = vadd.xlane.f32.xlu2 %v444_v4 }
 0x385   :  { %v455_v11 = vpop.xlane.xlu0 %454 }
 0x386   :  { %1064 = vrcp.f32 %v455_v11  ;;  %vm530_vm11 = vweird.f32 %v455_v11  ;;  %v534_v56 = vand.u32 2147483647, %v455_v11  ;;  %v536_v57 = vand.u32 2147483648, %v455_v11 }
 0x388   :  { %vm535_vm14 = vcmp.eq.f32.partialorder %v534_v56, 8.507059e+37  ;;  %v537_v18 = vor.u32 1.1754944e-38, %v536_v57 }
 0x38c   :  { %v1065_v38 = vpop.eup %1064 }
 0x38d   :  { %v1398_v39 = vpop.xlane.xlu0 %457  ;;  %v526_v40 = vmul.f32 %v1065_v38, %v455_v11  ;;  %vm531_vm10 = vweird.f32 %v1065_v38 }
 0x38e   :  { %1066 = vrcp.f32 %v1398_v39  ;;  %vm1417_vm12 = vmor %vm530_vm11, %vm531_vm10  ;;  %vm545_vm15 = vweird.f32 %v1398_v39  ;;  %v551_v33 = vand.u32 2147483648, %v1398_v39  ;;  %v549_v3 = vand.u32 2147483647, %v1398_v39 }
 0x38f   :  { %v1401_v41 = vpop.xlane.xlu1 %448  ;;  %v527_v42 = vsub.f32 1.0, %v526_v40 }
 0x390   :  { %1068 = vrcp.f32 %v1401_v41  ;;  %v552_v40 = vor.u32 1.1754944e-38, %v551_v33  ;;  %vm500_vm10 = vweird.f32 %v1401_v41 }
 0x391   :  { %v528_v45 = vmul.f32 %v1065_v38, %v527_v42  ;;  %v506_v42 = vand.u32 2147483648, %v1401_v41 }
 0x393   :  { %v529_v49 = vadd.f32 %v1065_v38, %v528_v45 }
 0x394   :  { %v1404_v43 = vpop.eup %1066 }
 0x395   :  { %v461_v44 = vpop.xlane.xlu2 %460  ;;  %v541_v46 = vmul.f32 %v1404_v43, %v1398_v39  ;;  %v533_v59 = vsel %vm1417_vm12, %v1065_v38, %v529_v49  ;;  %vm546_vm2 = vweird.f32 %v1404_v43 }
 0x396   :  { %1070 = vrcp.f32 %v461_v44  ;;  %v1408_v47 = vpop.eup %1068  ;;  %v564_v63 = vand.u32 2147483647, %v461_v44  ;;  %v566_v1 = vand.u32 2147483648, %v461_v44  ;;  %vm560_vm1 = vweird.f32 %v461_v44  ;;  %vm1441_vm5 = vmor %vm545_vm15, %vm546_vm2 }
 0x397   :  { %v1410_v48 = vpop.xlane.xlu1 %451  ;;  %v542_v51 = vsub.f32 1.0, %v541_v46  ;;  %v496_v52 = vmul.f32 %v1408_v47, %v1401_v41  ;;  %v538_v25 = vsel %vm535_vm14, %v537_v18, %v533_v59  ;;  %vm501_vm6 = vweird.f32 %v1408_v47 }
 0x398   :  { %1072 = vrcp.f32 %v1410_v48  ;;  %v567_v23 = vor.u32 1.1754944e-38, %v566_v1  ;;  %vm565_vm4 = vcmp.eq.f32.partialorder %v564_v63, 8.507059e+37  ;;  %v539_v8 = vmul.f32 %v1356_v60, %v538_v25  ;;  %vm1457_vm11 = vmor %vm500_vm10, %vm501_vm6 }
 0x399   :  { %v543_v61 = vmul.f32 %v1404_v43, %v542_v51  ;;  %v497_v62 = vsub.f32 1.0, %v496_v52  ;;  %v521_v59 = vand.u32 2147483648, %v1410_v48 }
 0x39b   :  { %v498_v22 = vmul.f32 %v1408_v47, %v497_v62  ;;  %v544_v26 = vadd.f32 %v1404_v43, %v543_v61  ;;  %v522_v63 = vor.u32 1.1754944e-38, %v521_v59 }
 0x39c   :  { %v1071_v50 = vpop.eup %1070 }
 0x39d   :  { %v556_v53 = vmul.f32 %v1071_v50, %v461_v44  ;;  %v1415_v54 = vpop.xlane.xlu2 %463  ;;  %vm561_vm13 = vweird.f32 %v1071_v50  ;;  %v499_v4 = vadd.f32 %v1408_v47, %v498_v22  ;;  %v548_v60 = vsel %vm1441_vm5, %v1404_v43, %v544_v26 }
 0x39e   :  { %1074 = vrcp.f32 %v1415_v54  ;;  %v1425_v17 = vpop.eup %1072  ;;  %vm562_vm3 = vmor %vm560_vm1, %vm561_vm13  ;;  %v581_v11 = vand.u32 2147483648, %v1415_v54  ;;  %v579_v39 = vand.u32 2147483647, %v1415_v54  ;;  %v504_v43 = vand.u32 2147483647, %v1401_v41 }
 0x39f   :  { %v557_v58 = vsub.f32 1.0, %v556_v53  ;;  %v511_v30 = vmul.f32 %v1425_v17, %v1410_v48  ;;  %vm575_vm12 = vweird.f32 %v1415_v54  ;;  %vm550_vm13 = vcmp.eq.f32.partialorder %v549_v3, 8.507059e+37 }
 0x3a0   :  { %v1017_v12 = vpop.permute.xlu0 %1016  ;;  %v582_v46 = vor.u32 1.1754944e-38, %v581_v11  ;;  %v553_v49 = vsel %vm550_vm13, %v552_v40, %v548_v60  ;;  %vm580_vm15 = vcmp.eq.f32.partialorder %v579_v39, 8.507059e+37  ;;  %v507_v53 = vor.u32 1.1754944e-38, %v506_v42  ;;  %v758_v39 = vld [vmem:[%s1613_s5 + $0x10] sm:$0xff]  ;;  %v757_v40 = vld [vmem:[%s1613_s5 + $0x8] sm:$0xff]  ;;  %v756_v42 = vld [vmem:[%s1613_s5] sm:$0xff] }
 0x3a1   :  { %v558_v13 = vmul.f32 %v1071_v50, %v557_v58  ;;  %v1019_v14 = vunpack.i.h.bf16 %v1017_v12  ;;  %v1018_v16 = vunpack.i.l.bf16 %v1017_v12  ;;  %vm505_vm1 = vcmp.eq.f32.partialorder %v504_v43, 8.507059e+37 }
 0x3a2   :  { %v554_v41 = vmul.f32 %v1360_v15, %v553_v49  ;;  %vm516_vm2 = vweird.f32 %v1425_v17 }
 0x3a3   :  { %v559_v20 = vadd.f32 %v1071_v50, %v558_v13  ;;  %681 = vmatpush.msrb.mxu2 %v1018_v16  ;;  %716 = vmatpush.msrb.mxu3 %v1019_v14 }
 0x3a4   :  { %v1075_v21 = vpop.eup %1074 }
 0x3a5   :  { %v563_v28 = vsel %vm562_vm3, %v1071_v50, %v559_v20  ;;  %v571_v31 = vmul.f32 %v1075_v21, %v1415_v54  ;;  %v1022_v32 = vpop.permute.xlu2 %1021  ;;  %vm576_vm7 = vweird.f32 %v1075_v21  ;;  %v503_v50 = vsel %vm1457_vm11, %v1408_v47, %v499_v4 }
 0x3a6   :  { %v568_v34 = vsel %vm565_vm4, %v567_v23, %v563_v28  ;;  %v1024_v35 = vunpack.i.h.bf16 %v1022_v32  ;;  %v1023_v36 = vunpack.i.l.bf16 %v1022_v32  ;;  %vm577_vm14 = vmor %vm575_vm12, %vm576_vm7  ;;  %v508_v57 = vsel %vm505_vm1, %v507_v53, %v503_v50 }
 0x3a7   :  { %v572_v37 = vsub.f32 1.0, %v571_v31  ;;  %v569_v7 = vmul.f32 %v1368_v24, %v568_v34  ;;  %v512_v24 = vsub.f32 1.0, %v511_v30  ;;  %vm515_vm3 = vweird.f32 %v1410_v48 }
 0x3a8   :  { %682 = vmatpush.msrb.mxu2 %v1023_v36  ;;  %717 = vmatpush.msrb.mxu3 %v1024_v35  ;;  %v509_v15 = vmul.f32 %v1364_v19, %v508_v57  ;;  %vm517_vm4 = vmor %vm515_vm3, %vm516_vm2  ;;  %vm753_vm1 = vcmask 195584  }
 0x3a9   :  { %v573_v38 = vmul.f32 %v1075_v21, %v572_v37  ;;  %999 = vmatmul.msk.f32.vlgmr.msrb.gmra.mxu2 %vm392_vm9, %v539_v8  ;;  %1001 = vmatmul.msk.f32.vlgmr.msrb.gmra.mxu3 %vm392_vm9, %v569_v7  ;;  %v513_v51 = vmul.f32 %v1425_v17, %v512_v24 }
 0x3ab   :  { %v574_v45 = vadd.f32 %v1075_v21, %v573_v38  ;;  %v514_v47 = vadd.f32 %v1425_v17, %v513_v51 }
 0x3ad   :  { %v578_v52 = vsel %vm577_vm14, %v1075_v21, %v574_v45  ;;  %v518_v62 = vsel %vm517_vm4, %v1425_v17, %v514_v47 }
 0x3ae   :  { %v583_v55 = vsel %vm580_vm15, %v582_v46, %v578_v52 }
 0x3af   :  { %v1027_v56 = vpop.permute.xlu1 %1026  ;;  %v584_v54 = vmul.f32 %v1376_v29, %v583_v55  ;;  %v519_v29 = vand.u32 2147483647, %v1410_v48 }
 0x3b0   :  { %v1028_v58 = vunpack.i.l.bf16 %v1027_v56  ;;  %v1029_v61 = vunpack.i.h.bf16 %v1027_v56 }
 0x3b1   :  { %1000 = vmatmul.msk.f32.gmra.mxu2 %vm392_vm9, %v554_v41  ;;  %1002 = vmatmul.msk.f32.gmra.mxu3 %vm392_vm9, %v584_v54  ;;  %vm520_vm5 = vcmp.eq.f32.partialorder %v519_v29, 8.507059e+37 }
 0x3b2   :  { %646 = vmatpush.msra.mxu1 %v1028_v58  ;;  %v523_v13 = vsel %vm520_vm5, %v522_v63, %v518_v62  ;;  %v1037_v58 = vld [vmem:[%s1614_s6] ss:$0 sm:$0xff] }
 0x3b3   :  { %v524_v16 = vmul.f32 %v1372_v27, %v523_v13 }
 0x3b4   :  { %647 = vmatpush.msra.mxu1 %v1029_v61 }
 0x3b5   :  { %997 = vmatmul.msk.f32.vlgmr.msra.gmra.mxu1 %vm392_vm9, %v509_v15 }
 0x3b7   :  { %v1032_v1 = vpop.permute.xlu1 %1031 }
 0x3b8   :  { %v1033_v12 = vunpack.i.l.bf16 %v1032_v1  ;;  %v1034_v14 = vunpack.i.h.bf16 %v1032_v1 }
 0x3ba   :  { %611 = vmatpush.msra.mxu0 %v1033_v12 }
 0x3bc   :  { %612 = vmatpush.msra.mxu0 %v1034_v14 }
 0x3bd   :  { %998 = vmatmul.msk.f32.gmra.mxu1 %vm392_vm9, %v524_v16 }
 0x3cb   :  { %v443_v19 = vpop.xlane.xlu0 %442 }
 0x3cc   :  { %1076 = vrcp.f32 %v443_v19  ;;  %v476_v21 = vand.u32 2147483648, %v443_v19  ;;  %v474_v17 = vand.u32 2147483647, %v443_v19  ;;  %vm470_vm7 = vweird.f32 %v443_v19 }
 0x3ce   :  { %v477_v25 = vor.u32 1.1754944e-38, %v476_v21  ;;  %vm475_vm11 = vcmp.eq.f32.partialorder %v474_v17, 8.507059e+37  ;;  %v854_v21 = vld [vmem:[%s1617_s9 + $0x18] sm:$0xff]  ;;  %v852_v17 = vld [vmem:[%s1617_s9 + $0x8] sm:$0xff] }
 0x3cf   :  { %877 = vmatpush.msrb.mxu1 %v854_v21 }
 0x3d2   :  { %v1077_v48 = vpop.eup %1076 }
 0x3d3   :  { %v466_v18 = vmul.f32 %v1077_v48, %v443_v19  ;;  %vm471_vm6 = vweird.f32 %v1077_v48 }
 0x3d4   :  { %vm472_vm10 = vmor %vm470_vm7, %vm471_vm6 }
 0x3d5   :  { %v467_v20 = vsub.f32 1.0, %v466_v18 }
 0x3d7   :  { %v468_v22 = vmul.f32 %v1077_v48, %v467_v20 }
 0x3d9   :  { %v469_v23 = vadd.f32 %v1077_v48, %v468_v22  ;;  %v853_v22 = vld [vmem:[%s1617_s9 + $0x10] sm:$0xff] }
 0x3da   :  { %878 = vmatpush.msrb.mxu1 %v853_v22 }
 0x3db   :  { %v473_v26 = vsel %vm472_vm10, %v1077_v48, %v469_v23  ;;  %v851_v23 = vld [vmem:[%s1617_s9] sm:$0xff] }
 0x3dc   :  { %v478_v28 = vsel %vm475_vm11, %v477_v25, %v473_v26  ;;  %879 = vmatpush.msrb.mxu1 %v852_v17 }
 0x3dd   :  { %v479_v27 = vmul.f32 %v1389_v5, %v478_v28 }
 0x3de   :  { %v446_v30 = vpop.xlane.xlu2 %445  ;;  %880 = vmatpush.msrb.mxu1 %v851_v23 }
 0x3df   :  { %1078 = vrcp.f32 %v446_v30  ;;  %995 = vmatmul.msk.f32.vlgmr.msra.gmra.mxu0 %vm392_vm9, %v479_v27  ;;  %v491_v34 = vand.u32 2147483648, %v446_v30  ;;  %v489_v36 = vand.u32 2147483647, %v446_v30  ;;  %vm485_vm13 = vweird.f32 %v446_v30  ;;  %v921_v27 = vld [vmem:[%s1619_s11 + $0x78] sm:$0xff] }
 0x3e0   :  { %926 = vmatpush.msra.mxu2 %v921_v27 }
 0x3e1   :  { %v492_v8 = vor.u32 1.1754944e-38, %v491_v34  ;;  %vm490_vm15 = vcmp.eq.f32.partialorder %v489_v36, 8.507059e+37  ;;  %v918_v34 = vld [vmem:[%s1619_s11 + $0x60] sm:$0xff] }
 0x3e5   :  { %v1079_v31 = vpop.eup %1078 }
 0x3e6   :  { %v481_v32 = vmul.f32 %v1079_v31, %v446_v30  ;;  %vm486_vm12 = vweird.f32 %v1079_v31  ;;  %v920_v30 = vld [vmem:[%s1619_s11 + $0x70] sm:$0xff] }
 0x3e7   :  { %vm487_vm14 = vmor %vm485_vm13, %vm486_vm12  ;;  %927 = vmatpush.msra.mxu2 %v920_v30 }
 0x3e8   :  { %v482_v33 = vsub.f32 1.0, %v481_v32 }
 0x3ea   :  { %v483_v35 = vmul.f32 %v1079_v31, %v482_v33 }
 0x3ec   :  { %v484_v37 = vadd.f32 %v1079_v31, %v483_v35 }
 0x3ee   :  { %v488_v7 = vsel %vm487_vm14, %v1079_v31, %v484_v37  ;;  %v919_v31 = vld [vmem:[%s1619_s11 + $0x68] sm:$0xff] }
 0x3ef   :  { %v493_v9 = vsel %vm490_vm15, %v492_v8, %v488_v7  ;;  %928 = vmatpush.msra.mxu2 %v919_v31  ;;  %v1041_v31 = vld [vmem:[%s1620_s12] ss:$0 sm:$0xff]  ;;  %s1121_s12 = smov 128  }
 0x3f0   :  { %v494_v5 = vmul.f32 %v1394_v6, %v493_v9  ;;  %v759_v6 = vld [vmem:[%s1613_s5 + $0x18] sm:$0xff]  ;;  %s957_s5 = sshll.u32 %s1120_s23, 4  ;;  %s958_s5 = int_to_ptr.vmem [resolvable:$true] %s957_s5 }
 0x3f1   :  { %782 = vmatpush.msrb.mxu0 %v759_v6  ;;  %929 = vmatpush.msra.mxu2 %v918_v34 }
 0x3f2   :  { %996 = vmatmul.msk.f32.gmra.mxu0 %vm392_vm9, %v494_v5 }
 0x3f3   :  { %783 = vmatpush.msrb.mxu0 %v758_v39 }
 0x3f5   :  { %784 = vmatpush.msrb.mxu0 %v757_v40 }
 0x3f7   :  { %785 = vmatpush.msrb.mxu0 %v756_v42 }
 0x42c   :  { %v719_v3 = vpop.f32.mrf.mxu3  ;;  %v684_v60 = vpop.f32.mrf.mxu2 }
 0x432   :  { %v649_v4 = vpop.f32.mrf.mxu1 }
 0x433   :  { %727 = vrot.lane.b32.xlu1 %v649_v4, %s1117_s30 }
 0x434   :  { %v722_v11 = vpop.f32.mrf.mxu3  ;;  %v687_v38 = vpop.f32.mrf.mxu2 }
 0x435   :  { %745 = vrot.lane.b32.xlu2 %v722_v11, %s1118_s14 }
 0x43a   :  { %v652_v24 = vpop.f32.mrf.mxu1 }
 0x43b   :  { %729 = vrot.lane.b32.xlu0 %v652_v24, %s1117_s30  ;;  %735 = vrot.lane.b32.xlu1 %v684_v60, %s1119_s15 }
 0x443   :  { %743 = vrot.lane.b32.xlu1 %v719_v3, %s1118_s14 }
 0x44b   :  { %737 = vrot.lane.b32.xlu1 %v687_v38, %s1119_s15  ;;  %v1039_v38 = vld [vmem:[%s1616_s8] ss:$0 sm:$0xff]  ;;  %s959_s8 = sshll.u32 %s1621_s13, 4  ;;  %s960_s8 = int_to_ptr.hbm [resolvable:$true] %s959_s8 }
 0x45c   :  { %v614_v45 = vpop.f32.mrf.mxu0 }
 0x46f   :  { %v617_v53 = vpop.f32.mrf.mxu0 }
 0x48f   :  { %v746_v41 = vpop.permute.xlu2 %745 }
 0x4a5   :  { %v728_v44 = vpop.permute.xlu1 %727 }
 0x4a6   :  { %v749_v46 = vsel %vm231_vm8, %v614_v45, %v728_v44 }
 0x4ad   :  { %v736_v43 = vpop.permute.xlu1 %735  ;;  %v730_v52 = vpop.permute.xlu0 %729 }
 0x4ae   :  { %v751_v49 = vsel %vm392_vm9, %v749_v46, %v736_v43  ;;  %v750_v55 = vsel %vm231_vm8, %v617_v53, %v730_v52  ;;  %v915_v52 = vld [vmem:[%s1619_s11 + $0x48] sm:$0xff]  ;;  %v914_v53 = vld [vmem:[%s1619_s11 + $0x40] sm:$0xff] }
 0x4b5   :  { %v744_v50 = vpop.permute.xlu1 %743 }
 0x4b6   :  { %v754_v51 = vsel %vm753_vm1, %v751_v49, %v744_v50  ;;  %v917_v50 = vld [vmem:[%s1619_s11 + $0x58] sm:$0xff] }
 0x4b7   :  { %1003 = vmatmul.msk.f32.vlgmr.msrb.gmra.mxu0 %vm49_vm0, %v754_v51  ;;  %930 = vmatpush.msra.mxu2 %v917_v50  ;;  %v916_v51 = vld [vmem:[%s1619_s11 + $0x50] sm:$0xff] }
 0x4b9   :  { %931 = vmatpush.msra.mxu2 %v916_v51 }
 0x4bb   :  { %932 = vmatpush.msra.mxu2 %v915_v52 }
 0x4bd   :  { %v738_v56 = vpop.permute.xlu1 %737  ;;  %933 = vmatpush.msra.mxu2 %v914_v53 }
 0x4be   :  { %v752_v54 = vsel %vm392_vm9, %v750_v55, %v738_v56  ;;  %v913_v55 = vld [vmem:[%s1619_s11 + $0x38] sm:$0xff]  ;;  %v912_v56 = vld [vmem:[%s1619_s11 + $0x30] sm:$0xff] }
 0x4bf   :  { %v755_v57 = vsel %vm753_vm1, %v752_v54, %v746_v41  ;;  %934 = vmatpush.msra.mxu2 %v913_v55  ;;  %v911_v41 = vld [vmem:[%s1619_s11 + $0x28] sm:$0xff]  ;;  %v910_v54 = vld [vmem:[%s1619_s11 + $0x20] sm:$0xff] }
 0x4c0   :  { %1004 = vmatmul.msk.f32.gmra.mxu0 %vm49_vm0, %v755_v57  ;;  %v909_v57 = vld [vmem:[%s1619_s11 + $0x18] sm:$0xff] }
 0x4c1   :  { %935 = vmatpush.msra.mxu2 %v912_v56 }
 0x4c3   :  { %936 = vmatpush.msra.mxu2 %v911_v41 }
 0x4c5   :  { %937 = vmatpush.msra.mxu2 %v910_v54 }
 0x4c7   :  { %938 = vmatpush.msra.mxu2 %v909_v57 }
 0x534   :  { %v787_v47 = vpop.f32.mrf.mxu0 }
 0x535   :  { %v788_v59 = vadd.f32 %v1037_v58, %v787_v47  ;;  %v907_v47 = vld [vmem:[%s1619_s11 + $0x8] sm:$0xff] }
 0x537   :  { %v1509_v61 = vadd.f32 %v788_v59, %v1195_v0  ;;  %v906_v59 = vld [vmem:[%s1619_s11] sm:$0xff] }
 0x539   :  { %v797_v15 = vsel %vm49_vm0, %v1509_v61, 0.0 }
 0x53a   :  { %798 = vadd.xlane.f32.xlu1 %v797_v15  ;;  %v1040_v15 = vld [vmem:[%s1618_s10] ss:$0 sm:$0xff] }
 0x53d   :  { %v790_v29 = vpop.f32.mrf.mxu0 }
 0x53e   :  { %v791_v62 = vadd.f32 %v1037_v58, %v790_v29  ;;  %v908_v58 = vld [vmem:[%s1619_s11 + $0x10] sm:$0xff] }
 0x53f   :  { %939 = vmatpush.msra.mxu2 %v908_v58 }
 0x540   :  { %v1514_v63 = vadd.f32 %v791_v62, %v1202_v2 }
 0x541   :  { %940 = vmatpush.msra.mxu2 %v907_v47 }
 0x542   :  { %v800_v1 = vsel %vm49_vm0, %v1514_v63, 0.0 }
 0x543   :  { %801 = vadd.xlane.f32.xlu0 %v800_v1  ;;  %941 = vmatpush.msra.mxu2 %v906_v59 }
 0x5ad   :  { %v799_v12 = vpop.xlane.xlu1 %798 }
 0x5ae   :  { %v803_v13 = vmul.f32 %v799_v12, %v1206_v10 }
 0x5b0   :  { %v805_v14 = vsub.f32 %v1509_v61, %v803_v13 }
 0x5b2   :  { %v807_v0 = vmul.f32 %v805_v14, %v805_v14 }
 0x5b4   :  { %v809_v16 = vsel %vm49_vm0, %v807_v0, 0.0 }
 0x5b5   :  { %810 = vadd.xlane.f32.xlu2 %v809_v16 }
 0x5b6   :  { %v802_v19 = vpop.xlane.xlu0 %801 }
 0x5b7   :  { %v804_v48 = vmul.f32 %v802_v19, %v1206_v10 }
 0x5b9   :  { %v806_v18 = vsub.f32 %v1514_v63, %v804_v48 }
 0x5bb   :  { %v808_v2 = vmul.f32 %v806_v18, %v806_v18 }
 0x5bd   :  { %v812_v20 = vsel %vm49_vm0, %v808_v2, 0.0 }
 0x5be   :  { %813 = vadd.xlane.f32.xlu1 %v812_v20 }
 0x628   :  { %v811_v25 = vpop.xlane.xlu2 %810 }
 0x629   :  { %v815_v26 = vmul.f32 %v811_v25, %v1206_v10 }
 0x62b   :  { %v817_v28 = vadd.f32 1e-05, %v815_v26 }
 0x62d   :  { %1080 = vrsqrt.f32 %v817_v28  ;;  %vm825_vm9 = vweird.f32 %v817_v28 }
 0x631   :  { %v814_v32 = vpop.xlane.xlu1 %813 }
 0x632   :  { %v816_v33 = vmul.f32 %v814_v32, %v1206_v10  ;;  %v1038_v10 = vld [vmem:[%s1615_s7] ss:$0 sm:$0xff] }
 0x633   :  { %v1081_v35 = vpop.eup %1080 }
 0x634   :  { %v820_v36 = vmul.f32 %v1081_v35, %v817_v28  ;;  %v818_v37 = vadd.f32 1e-05, %v816_v33  ;;  %vm826_vm8 = vweird.f32 %v1081_v35 }
 0x635   :  { %vm827_vm2 = vmor %vm825_vm9, %vm826_vm8 }
 0x636   :  { %v821_v8 = vmul.f32 %v1081_v35, %v820_v36  ;;  %1082 = vrsqrt.f32 %v818_v37  ;;  %vm835_vm4 = vweird.f32 %v818_v37 }
 0x638   :  { %v822_v7 = vmul.f32 0.5, %v821_v8 }
 0x63a   :  { %v823_v9 = vsub.f32 1.5, %v822_v7 }
 0x63c   :  { %v1083_v5 = vpop.eup %1082  ;;  %v824_v3 = vmul.f32 %v1081_v35, %v823_v9 }
 0x63d   :  { %v830_v4 = vmul.f32 %v1083_v5, %v818_v37  ;;  %vm836_vm3 = vweird.f32 %v1083_v5 }
 0x63e   :  { %v828_v11 = vsel %vm827_vm2, %v1081_v35, %v824_v3  ;;  %vm837_vm5 = vmor %vm835_vm4, %vm836_vm3 }
 0x63f   :  { %v839_v60 = vmul.f32 %v828_v11, %v805_v14  ;;  %v831_v24 = vmul.f32 %v1083_v5, %v830_v4 }
 0x641   :  { %v844_v6 = vmul.f32 %v1038_v10, %v839_v60  ;;  %v832_v39 = vmul.f32 0.5, %v831_v24 }
 0x643   :  { %v833_v40 = vsub.f32 1.5, %v832_v39  ;;  %v849_v42 = vadd.f32 %v1039_v38, %v844_v6 }
 0x645   :  { %v834_v44 = vmul.f32 %v1083_v5, %v833_v40  ;;  %1005 = vmatmul.msk.f32.vlgmr.msrb.gmra.mxu1 %vm49_vm0, %v849_v42 }
 0x647   :  { %v838_v43 = vsel %vm837_vm5, %v1083_v5, %v834_v44 }
 0x648   :  { %v840_v45 = vmul.f32 %v838_v43, %v806_v18 }
 0x64a   :  { %v845_v46 = vmul.f32 %v1038_v10, %v840_v45 }
 0x64c   :  { %v850_v49 = vadd.f32 %v1039_v38, %v845_v46 }
 0x64e   :  { %1006 = vmatmul.msk.f32.gmra.mxu1 %vm49_vm0, %v850_v49 }
 0x6c2   :  { %v882_v29 = vpop.f32.mrf.mxu1 }
 0x6c3   :  { %v883_v62 = vadd.f32 %v1040_v15, %v882_v29 }
 0x6c5   :  { %v890_v1 = vmul.f32 0.044715, %v883_v62  ;;  %v888_v22 = vmul.f32 0.5, %v883_v62 }
 0x6c7   :  { %v892_v12 = vmul.f32 %v890_v1, %v883_v62 }
 0x6c9   :  { %v894_v13 = vmul.f32 %v892_v12, %v883_v62 }
 0x6cb   :  { %v885_v14 = vpop.f32.mrf.mxu1  ;;  %v896_v0 = vadd.f32 %v894_v13, %v883_v62 }
 0x6cc   :  { %v886_v16 = vadd.f32 %v1040_v15, %v885_v14 }
 0x6cd   :  { %v898_v19 = vmul.f32 0.7978846, %v896_v0 }
 0x6ce   :  { %v891_v48 = vmul.f32 0.044715, %v886_v16  ;;  %v889_v28 = vmul.f32 0.5, %v886_v16 }
 0x6cf   :  { %1084 = vtanh.f32 %v898_v19 }
 0x6d0   :  { %v893_v18 = vmul.f32 %v891_v48, %v886_v16 }
 0x6d2   :  { %v895_v2 = vmul.f32 %v893_v18, %v886_v16 }
 0x6d4   :  { %v897_v20 = vadd.f32 %v895_v2, %v886_v16 }
 0x6d5   :  { %v1085_v21 = vpop.eup %1084 }
 0x6d6   :  { %v902_v17 = vadd.f32 1.0, %v1085_v21  ;;  %v899_v23 = vmul.f32 0.7978846, %v897_v20 }
 0x6d8   :  { %v904_v25 = vmul.f32 %v902_v17, %v888_v22  ;;  %1086 = vtanh.f32 %v899_v23 }
 0x6da   :  { %942 = vmatmul.f32.vlgmr.msra.gmra.mxu2 %v904_v25 }
 0x6de   :  { %v1087_v26 = vpop.eup %1086 }
 0x6df   :  { %v903_v27 = vadd.f32 1.0, %v1087_v26 }
 0x6e1   :  { %v905_v30 = vmul.f32 %v903_v27, %v889_v28 }
 0x6e3   :  { %945 = vmatmul.f32.gmra.mxu2 %v905_v30 }
 0x75d   :  { %v943_v32 = vpop.f32.mrf.mxu2 }
 0x75e   :  { %v944_v33 = vadd.f32 %v1041_v31, %v943_v32 }
 0x760   :  { %v949_v34 = vadd.f32 %v944_v33, %v1509_v61 }
 0x762   :  { %951 = vst.msk [vmem:[#allocation2] sm:$0xff] %vm49_vm0, %v949_v34 }
 0x766   :  { %v946_v35 = vpop.f32.mrf.mxu2 }
 0x767   :  { %v947_v36 = vadd.f32 %v1041_v31, %v946_v35 }
 0x769   :  { %v950_v37 = vadd.f32 %v947_v36, %v1514_v63 }
 0x76b   :  { %952 = vst.msk [vmem:[#allocation2 + $0x8] sm:$0xff] %vm49_vm0, %v950_v37 }
 0x76c   :  { %965 = dma.vmem_to_hbm [thread:$0]  %s958_s5, 256, %s960_s8, [#allocation3], %s1121_s12, %s1121_s12, %s1117_s30  }
 0x76d   :  { %1112 = dma.done.wait [#allocation3], 256  }
 0x76e   :  { %1113 = vsyncadd [#allocation3], 4294967040 }
 0x76f   :  { %970 = vsyncpa [#allocation3], 1 }

</bundles_post_ra>
